<compile_context>
chip_gen: v7x
topology: tpu7x:2x2x1
jax: 0.10.0
libtpu: 0.0.40
codegen_flags: <defaults>
</compile_context>

<pallas_src>
import jax
import jax.numpy as jnp
from jax.experimental import pallas as pl
from jax.experimental.pallas import tpu as pltpu


def _scale_kernel(scale_ref, x_ref, o_ref):
    # scale_ref: (1,) f32 in SMEM; x_ref / o_ref: VMEM tiles.
    o_ref[...] = (x_ref[...] * scale_ref[0]).astype(o_ref.dtype)


_LANE_CANDIDATES = (2048, 1024, 512, 256, 128)


def _device_profile():
    """Returns (target bytes per block buffer, vmem_limit_bytes or None, min grid steps)."""
    kind = ""
    try:
        kind = jax.devices()[0].device_kind.lower()
    except Exception:
        pass
    if "v6" in kind:
        # v6e: 32 MiB scoped default / 128 MiB physical -> grow blocks, raise limit.
        return 4 * 1024 * 1024, 64 << 20, 1
    if "v7" in kind:
        # v7x: 64 MiB VMEM per TC but two TCs; modest blocks and >=4 grid steps
        # (when rows permit) so the "parallel" axis shards across both cores.
        return 2 * 1024 * 1024, None, 4
    # v5e / unknown: stay inside the 16 MiB scoped-VMEM default
    # (in+out double-buffered => ~4 x 2 MiB resident).
    return 2 * 1024 * 1024, None, 1


def _choose_lane(n, sub):
    """Largest lane width (multiple of 128) dividing n; prefer rows >= sublane mult."""
    for cand in _LANE_CANDIDATES:
        if n % cand == 0 and (n // cand) >= sub:
            return cand
    for cand in _LANE_CANDIDATES:
        if n % cand == 0:
            return cand
    return 128  # unreachable: n is always a multiple of 128 here


def _choose_block_rows(rows, lane, itemsize, sub, target_bytes, min_steps):
    if rows <= sub:
        return rows  # full-extent row block (equals array dim -> allowed)
    target_rows = max(sub, (target_bytes // (lane * itemsize)) // sub * sub)
    if min_steps > 1:
        cap = (rows // min_steps) // sub * sub
        if cap >= sub:  # only constrain when rows permit >= min_steps full blocks
            target_rows = min(target_rows, cap)
    return max(sub, min(target_rows, (rows // sub) * sub))


def scale_forward(x: jax.Array, scale: jax.Array) -> jax.Array:
    """x: arbitrary-shape array (e.g. NCHW); scale: shape-(1,) float32 parameter."""
    orig_shape = x.shape
    orig_dtype = x.dtype
    total = x.size
    scale_f32 = scale.astype(jnp.float32)

    if total == 0:
        return x
    if total < 128:
        # Too small to form a lane-dense tile; not worth a kernel launch.
        return (x * scale_f32[0]).astype(orig_dtype)

    itemsize = jnp.dtype(orig_dtype).itemsize
    sub = {4: 8, 2: 16, 1: 32}.get(itemsize, 8)  # sublane multiple per dtype packing

    x_flat = x.reshape(-1)
    tail = total % 128
    main = total - tail  # largest 128-divisible prefix (no pad / no slice-off pass)

    lane = _choose_lane(main, sub)
    rows = main // lane

    target_bytes, vmem_limit, min_steps = _device_profile()
    block_rows = _choose_block_rows(rows, lane, itemsize, sub, target_bytes, min_steps)
    grid = (pl.cdiv(rows, block_rows),)  # ragged last row-block is masked by Pallas

    compiler_kwargs = dict(dimension_semantics=("parallel",))
    if vmem_limit is not None:
        compiler_kwargs["vmem_limit_bytes"] = vmem_limit

    main_2d = (x_flat[:main] if tail else x_flat).reshape(rows, lane)

    out_2d = pl.pallas_call(
        _scale_kernel,
        out_shape=jax.ShapeDtypeStruct((rows, lane), orig_dtype),
        grid_spec=pltpu.PrefetchScalarGridSpec(
            num_scalar_prefetch=0,
            grid=grid,
            in_specs=[
                pl.BlockSpec(memory_space=pltpu.MemorySpace.SMEM),   # scale (f32)
                pl.BlockSpec((block_rows, lane), lambda i: (i, 0)),  # x tile
            ],
            out_specs=pl.BlockSpec((block_rows, lane), lambda i: (i, 0)),
        ),
        compiler_params=pltpu.CompilerParams(**compiler_kwargs),
        cost_estimate=pl.CostEstimate(
            flops=rows * lane,
            transcendentals=0,
            bytes_accessed=2 * rows * lane * itemsize,
        ),
    )(scale_f32, main_2d)

    out_flat = out_2d.reshape(-1)
    if tail:
        # < 128 leftover elements: tiny fused multiply, no extra full-tensor pass.
        tail_out = (x_flat[main:] * scale_f32[0]).astype(orig_dtype)
        out_flat = jnp.concatenate([out_flat, tail_out])
    return out_flat.reshape(orig_shape)


if __name__ == "__main__":
    key = jax.random.PRNGKey(0)
    # NCHW input, small shape (like an ATSS bbox-pred feature map).
    x = jax.random.normal(key, (2, 4, 16, 16), dtype=jnp.float32)

    # Scale(init_value=1.0) parameter; non-trivial value so the multiply is exercised.
    init_value = 1.0
    scale_param = jnp.array([init_value], dtype=jnp.float32) * 2.5  # scale = 2.5

    fwd = jax.jit(scale_forward)

    out = jax.block_until_ready(fwd(x, scale_param))
    ref = x * scale_param[0]
    assert out.shape == x.shape and out.dtype == x.dtype
    assert jnp.allclose(out, ref, atol=1e-6, rtol=1e-6)

    # Also exercise a non-128-divisible size (prefix kernel + fused tail path).
    x2 = jax.random.normal(jax.random.PRNGKey(1), (3, 4, 13, 7), dtype=jnp.float32)
    out2 = jax.block_until_ready(fwd(x2, scale_param))
    assert jnp.allclose(out2, x2 * scale_param[0], atol=1e-6, rtol=1e-6)

    print("KERNEL_OK")
</pallas_src>

<mosaic_0001>
module attributes {stable_mosaic.version = 11 : i64} {
  func.func @_scale_kernel(%arg0: i32, %arg1: memref<1xf32, #tpu.memory_space<smem>>, %arg2: memref<8x256xf32, #tpu.memory_space<vmem>>, %arg3: memref<8x256xf32, #tpu.memory_space<vmem>>) attributes {dimension_semantics = [#tpu.dimension_semantics<parallel>], iteration_bounds = array<i64: 1>, scalar_prefetch = 0 : i64, scratch_operands = 0 : i64, tpu.core_type = #tpu.core_type<tc>, window_params = [{transform_indices = @transform_0, window_bounds = array<i64: 1>}, {transform_indices = @transform_1, window_bounds = array<i64: 8, 256>}, {transform_indices = @transform_2, window_bounds = array<i64: 8, 256>}]} {
    %c0 = arith.constant 0 : index
    %c0_0 = arith.constant 0 : index
    %0 = vector.load %arg2[%c0, %c0_0] : memref<8x256xf32, #tpu.memory_space<vmem>>, vector<8x256xf32>
    %c0_1 = arith.constant 0 : index
    %1 = memref.load %arg1[%c0_1] : memref<1xf32, #tpu.memory_space<smem>>
    %2 = vector.broadcast %1 : f32 to vector<8x256xf32>
    %3 = arith.mulf %0, %2 : vector<8x256xf32>
    %c0_2 = arith.constant 0 : index
    %c0_3 = arith.constant 0 : index
    %4 = vector.load %arg3[%c0_2, %c0_3] : memref<8x256xf32, #tpu.memory_space<vmem>>, vector<8x256xf32>
    tpu.vector_store %arg3[%c0_2, %c0_3], %3 {strides = array<i32>} : memref<8x256xf32, #tpu.memory_space<vmem>>, vector<8x256xf32>,
    return
  }
  func.func @transform_0(%arg0: i32) -> i32 {
    %c0_i32 = arith.constant 0 : i32
    %c0_i32_0 = arith.constant 0 : i32
    return %c0_i32 : i32
  }
  func.func @transform_1(%arg0: i32) -> (i32, i32) {
    %c0_i32 = arith.constant 0 : i32
    %c0_i32_0 = arith.constant 0 : i32
    return %arg0, %c0_i32 : i32, i32
  }
  func.func @transform_2(%arg0: i32) -> (i32, i32) {
    %c0_i32 = arith.constant 0 : i32
    %c0_i32_0 = arith.constant 0 : i32
    return %arg0, %c0_i32 : i32, i32
  }
}

</mosaic_0001>

<bundles_post_ra>
// kernel: scale_forward.1
= control target key start
LH: loop header
LB: loop body
LE: loop exit
PB: predicated region body
PF: predicated region fallthrough
CT: control target
= control target key end

     0   :  { %s54_s0 = inlined_call_operand.<no memory space> [shape: f32[1], index: 0, kind: input, shape index: {}]   ;;  %s55_s1 = inlined_call_operand.vmem [shape: f32[8,256], index: 1, kind: input, shape index: {}]   ;;  %s56_s2 = inlined_call_operand.vmem [shape: f32[8,256], index: 2, kind: output, shape index: {}]  }
   0x1   :  { %v12_v0 = vld [vmem:[%s55_s1] sm:$0xff]  ;;  %v15_v1 = vstv %s54_s0  ;;  %v13_v2 = vld [vmem:[%s55_s1 + $0x8] sm:$0xff] }
   0x2   :  { %v16_v3 = vmul.f32 %v15_v1, %v12_v0  ;;  %v17_v4 = vmul.f32 %v15_v1, %v13_v2 }
   0x4   :  { %18 = vst [vmem:[%s56_s2] sm:$0xff] %v16_v3  ;;  %19 = vst [vmem:[%s56_s2 + $0x8] sm:$0xff] %v17_v4 }

</bundles_post_ra>
